<compile_context>
chip_gen: v7x
topology: tpu7x:2x2x1
jax: 0.10.0
libtpu: 0.0.40
codegen_flags: <defaults>
</compile_context>

<pallas_src>
import functools

import jax
import jax.numpy as jnp
from jax.experimental import pallas as pl
from jax.experimental.pallas import tpu as pltpu


IN_NC = 3
NC = 1600
OUT_NC = 18
NUM_SHEETS = 4
OUT_DIM = OUT_NC * NUM_SHEETS          # 72
OUT_PAD = 128                          # lane-dense padded output width
NEG_SLOPE = 0.01                       # nn.LeakyReLU default


def _round_up(x, m):
    return (x + m - 1) // m * m


def _mlp_kernel(x_ref, w1_ref, b1_ref, w2_ref, b2_ref, o_ref):
    # x: (tile_b, IN_NC) f32, w1: (IN_NC, NC) f32, b1: (1, NC) f32
    # w2: (NC, OUT_PAD) f32 or bf16, b2: (1, OUT_PAD) f32
    x = x_ref[...]
    w1 = w1_ref[...]

    # ---- Layer 1 on the VPU ------------------------------------------------
    # K = IN_NC = 3: an MXU matmul would be >97% zero padding, so do it as
    # IN_NC broadcast multiply-accumulates instead (VALU slots have slack).
    h = x[:, 0:1] * w1[0:1, :]                      # (tile_b, NC)
    for k in range(1, IN_NC):                        # statically unrolled
        h = h + x[:, k:k + 1] * w1[k:k + 1, :]
    h = h + b1_ref[...]

    # LeakyReLU in f32 (v5e VPU has no bf16 elementwise support anyway).
    h = jnp.where(h > 0, h, NEG_SLOPE * h)

    # ---- Layer 2 on the MXU ------------------------------------------------
    # bf16 (or f32) inputs, f32 accumulation.
    o = jnp.dot(h.astype(w2_ref.dtype), w2_ref[...],
                preferred_element_type=jnp.float32)
    o = o + b2_ref[...]
    o_ref[...] = o.astype(o_ref.dtype)


@functools.partial(jax.jit, static_argnames=("tile_b", "use_bf16_mxu"))
def nonlinear_type_forward(inp, w1, b1, w2, b2, *, tile_b=512,
                           use_bf16_mxu=True):
    """inp: (B, IN_NC) f32 -> (B, NUM_SHEETS, OUT_NC) f32."""
    B = inp.shape[0]

    # Effective batch tile: large for MXU occupancy / per-step overhead
    # amortization, but never bigger than the (8-row rounded) batch.
    tb = min(int(tile_b), _round_up(max(B, 8), 8))
    tb = max(_round_up(tb, 8), 8)

    B_pad = _round_up(B, tb)
    if B_pad != B:
        inp = jnp.pad(inp, ((0, B_pad - B), (0, 0)))

    # Lane-dense output: pad 72 -> 128 columns (zero weights/bias), slice later.
    w2p = jnp.pad(w2, ((0, 0), (0, OUT_PAD - OUT_DIM)))
    b2p = jnp.pad(b2.reshape(1, OUT_DIM), ((0, 0), (0, OUT_PAD - OUT_DIM)))
    if use_bf16_mxu:
        w2p = w2p.astype(jnp.bfloat16)
    b1_2d = b1.reshape(1, NC)

    grid = (B_pad // tb,)

    flops = 2 * B_pad * (IN_NC * NC + NC * OUT_PAD)
    bytes_accessed = (B_pad * IN_NC * 4                       # inp
                      + IN_NC * NC * 4 + NC * 4               # w1, b1
                      + NC * OUT_PAD * w2p.dtype.itemsize     # w2
                      + OUT_PAD * 4                           # b2
                      + B_pad * OUT_PAD * 4)                  # out
    cost = pl.CostEstimate(flops=flops, transcendentals=0,
                           bytes_accessed=bytes_accessed)

    out2d = pl.pallas_call(
        _mlp_kernel,
        out_shape=jax.ShapeDtypeStruct((B_pad, OUT_PAD), jnp.float32),
        grid_spec=pltpu.PrefetchScalarGridSpec(
            num_scalar_prefetch=0,
            grid=grid,
            in_specs=[
                pl.BlockSpec((tb, IN_NC), lambda i: (i, 0)),     # x tile
                pl.BlockSpec((IN_NC, NC), lambda i: (0, 0)),     # W1 (resident)
                pl.BlockSpec((1, NC), lambda i: (0, 0)),         # b1
                pl.BlockSpec((NC, OUT_PAD), lambda i: (0, 0)),   # W2 (resident)
                pl.BlockSpec((1, OUT_PAD), lambda i: (0, 0)),    # b2
            ],
            out_specs=pl.BlockSpec((tb, OUT_PAD), lambda i: (i, 0)),
        ),
        compiler_params=pltpu.CompilerParams(
            # Single batch axis, fully independent -> megacore-shardable on v7x.
            dimension_semantics=("parallel",)),
        cost_estimate=cost,
    )(inp, w1, b1_2d, w2p, b2p)

    out2d = out2d[:B, :OUT_DIM]
    return out2d.reshape(-1, NUM_SHEETS, OUT_NC)


def init_params(key):
    """Deterministic parameter init (shapes match the nn.Linear layers,
    weights kept kernel-friendly as (in, out))."""
    k1, k2, k3, k4 = jax.random.split(key, 4)
    w1 = jax.random.normal(k1, (IN_NC, NC), jnp.float32) * 0.05
    b1 = jax.random.normal(k2, (NC,), jnp.float32) * 0.05
    w2 = jax.random.normal(k3, (NC, OUT_DIM), jnp.float32) * 0.02
    b2 = jax.random.normal(k4, (OUT_DIM,), jnp.float32) * 0.02
    return w1, b1, w2, b2


def reference_forward(inp, w1, b1, w2, b2):
    h = inp @ w1 + b1
    h = jnp.where(h > 0, h, NEG_SLOPE * h)
    o = h @ w2 + b2
    return o.reshape(-1, NUM_SHEETS, OUT_NC)


if __name__ == "__main__":
    key = jax.random.PRNGKey(0)
    kx, kp = jax.random.split(key)
    w1, b1, w2, b2 = init_params(kp)

    # Case 1: small batch, single grid step, exact f32 path.
    B = 8
    inp = jax.random.normal(kx, (B, IN_NC), jnp.float32)
    out_f32 = jax.block_until_ready(
        nonlinear_type_forward(inp, w1, b1, w2, b2, use_bf16_mxu=False))
    ref = reference_forward(inp, w1, b1, w2, b2)
    assert out_f32.shape == (B, NUM_SHEETS, OUT_NC), out_f32.shape
    assert jnp.allclose(out_f32, ref, atol=1e-4, rtol=1e-4), "f32 mismatch"

    # Case 2: bf16 MXU path on the same inputs (relaxed tolerance).
    out_bf16 = jax.block_until_ready(
        nonlinear_type_forward(inp, w1, b1, w2, b2, use_bf16_mxu=True))
    assert jnp.allclose(out_bf16, ref, atol=1e-2, rtol=5e-2), "bf16 mismatch"

    # Case 3: multi-step grid + batch padding (B=40, tile_b=16 -> 3 steps).
    B2 = 40
    inp2 = jax.random.normal(jax.random.fold_in(kx, 1), (B2, IN_NC), jnp.float32)
    out2 = jax.block_until_ready(
        nonlinear_type_forward(inp2, w1, b1, w2, b2, tile_b=16,
                               use_bf16_mxu=True))
    ref2 = reference_forward(inp2, w1, b1, w2, b2)
    assert out2.shape == (B2, NUM_SHEETS, OUT_NC), out2.shape
    assert jnp.allclose(out2, ref2, atol=1e-2, rtol=5e-2), "multi-step mismatch"

    print("KERNEL_OK")
</pallas_src>

<mosaic_0001>
module attributes {stable_mosaic.version = 11 : i64} {
  func.func @_mlp_kernel(%arg0: i32, %arg1: memref<8x3xf32, #tpu.memory_space<vmem>>, %arg2: memref<3x1600xf32, #tpu.memory_space<vmem>>, %arg3: memref<1x1600xf32, #tpu.memory_space<vmem>>, %arg4: memref<1600x128xf32, #tpu.memory_space<vmem>>, %arg5: memref<1x128xf32, #tpu.memory_space<vmem>>, %arg6: memref<8x128xf32, #tpu.memory_space<vmem>>) attributes {dimension_semantics = [#tpu.dimension_semantics<parallel>], iteration_bounds = array<i64: 1>, scalar_prefetch = 0 : i64, scratch_operands = 0 : i64, tpu.core_type = #tpu.core_type<tc>, window_params = [{transform_indices = @transform_0, window_bounds = array<i64: 8, 3>}, {pipeline_mode = #tpu.pipeline_mode<synchronous>, transform_indices = @transform_1, window_bounds = array<i64: 3, 1600>}, {pipeline_mode = #tpu.pipeline_mode<synchronous>, transform_indices = @transform_2, window_bounds = array<i64: 1, 1600>}, {pipeline_mode = #tpu.pipeline_mode<synchronous>, transform_indices = @transform_3, window_bounds = array<i64: 1600, 128>}, {pipeline_mode = #tpu.pipeline_mode<synchronous>, transform_indices = @transform_4, window_bounds = array<i64: 1, 128>}, {transform_indices = @transform_5, window_bounds = array<i64: 8, 128>}]} {
    %c0 = arith.constant 0 : index
    %c0_0 = arith.constant 0 : index
    %0 = vector.load %arg1[%c0, %c0_0] : memref<8x3xf32, #tpu.memory_space<vmem>>, vector<8x3xf32>
    %c0_1 = arith.constant 0 : index
    %c0_2 = arith.constant 0 : index
    %1 = vector.load %arg2[%c0_1, %c0_2] : memref<3x1600xf32, #tpu.memory_space<vmem>>, vector<3x1600xf32>
    %2 = vector.extract_strided_slice %0 {offsets = [0, 0], sizes = [8, 1], strides = [1, 1]} : vector<8x3xf32> to vector<8x1xf32>
    %3 = vector.extract_strided_slice %1 {offsets = [0, 0], sizes = [1, 1600], strides = [1, 1]} : vector<3x1600xf32> to vector<1x1600xf32>
    %4 = vector.broadcast %2 : vector<8x1xf32> to vector<8x1600xf32>
    %5 = vector.broadcast %3 : vector<1x1600xf32> to vector<8x1600xf32>
    %6 = arith.mulf %4, %5 : vector<8x1600xf32>
    %7 = vector.extract_strided_slice %0 {offsets = [0, 1], sizes = [8, 1], strides = [1, 1]} : vector<8x3xf32> to vector<8x1xf32>
    %8 = vector.extract_strided_slice %1 {offsets = [1, 0], sizes = [1, 1600], strides = [1, 1]} : vector<3x1600xf32> to vector<1x1600xf32>
    %9 = vector.broadcast %7 : vector<8x1xf32> to vector<8x1600xf32>
    %10 = vector.broadcast %8 : vector<1x1600xf32> to vector<8x1600xf32>
    %11 = arith.mulf %9, %10 : vector<8x1600xf32>
    %12 = arith.addf %6, %11 : vector<8x1600xf32>
    %13 = vector.extract_strided_slice %0 {offsets = [0, 2], sizes = [8, 1], strides = [1, 1]} : vector<8x3xf32> to vector<8x1xf32>
    %14 = vector.extract_strided_slice %1 {offsets = [2, 0], sizes = [1, 1600], strides = [1, 1]} : vector<3x1600xf32> to vector<1x1600xf32>
    %15 = vector.broadcast %13 : vector<8x1xf32> to vector<8x1600xf32>
    %16 = vector.broadcast %14 : vector<1x1600xf32> to vector<8x1600xf32>
    %17 = arith.mulf %15, %16 : vector<8x1600xf32>
    %18 = arith.addf %12, %17 : vector<8x1600xf32>
    %c0_3 = arith.constant 0 : index
    %c0_4 = arith.constant 0 : index
    %19 = vector.load %arg3[%c0_3, %c0_4] : memref<1x1600xf32, #tpu.memory_space<vmem>>, vector<1x1600xf32>
    %20 = vector.broadcast %19 : vector<1x1600xf32> to vector<8x1600xf32>
    %21 = arith.addf %18, %20 : vector<8x1600xf32>
    %cst = arith.constant 0.000000e+00 : f32
    %22 = vector.broadcast %cst : f32 to vector<8x1600xf32>
    %23 = arith.cmpf ogt, %21, %22 : vector<8x1600xf32>
    %cst_5 = arith.constant 0.00999999977 : f32
    %24 = vector.broadcast %cst_5 : f32 to vector<8x1600xf32>
    %25 = arith.mulf %24, %21 : vector<8x1600xf32>
    %26 = arith.select %23, %21, %25 : vector<8x1600xi1>, vector<8x1600xf32>
    %c0_6 = arith.constant 0 : index
    %c0_7 = arith.constant 0 : index
    %27 = vector.load %arg4[%c0_6, %c0_7] : memref<1600x128xf32, #tpu.memory_space<vmem>>, vector<1600x128xf32>
    %cst_8 = arith.constant dense<0.000000e+00> : vector<8x128xf32>
    %28 = tpu.matmul %26, %27, %cst_8 {dimension_numbers = #tpu.dot_dimension_numbers<[1], [0], [0], [1], [0, 0, 1, 1], [], []>} : vector<8x1600xf32>, vector<1600x128xf32>, vector<8x128xf32> -> vector<8x128xf32>
    %c0_9 = arith.constant 0 : index
    %c0_10 = arith.constant 0 : index
    %29 = vector.load %arg5[%c0_9, %c0_10] : memref<1x128xf32, #tpu.memory_space<vmem>>, vector<1x128xf32>
    %30 = vector.broadcast %29 : vector<1x128xf32> to vector<8x128xf32>
    %31 = arith.addf %28, %30 : vector<8x128xf32>
    %c0_11 = arith.constant 0 : index
    %c0_12 = arith.constant 0 : index
    %32 = vector.load %arg6[%c0_11, %c0_12] : memref<8x128xf32, #tpu.memory_space<vmem>>, vector<8x128xf32>
    tpu.vector_store %arg6[%c0_11, %c0_12], %31 {strides = array<i32>} : memref<8x128xf32, #tpu.memory_space<vmem>>, vector<8x128xf32>,
    return
  }
  func.func @transform_0(%arg0: i32) -> (i32, i32) {
    %c0_i32 = arith.constant 0 : i32
    %c0_i32_0 = arith.constant 0 : i32
    return %arg0, %c0_i32 : i32, i32
  }
  func.func @transform_1(%arg0: i32) -> (i32, i32) {
    %c0_i32 = arith.constant 0 : i32
    %c0_i32_0 = arith.constant 0 : i32
    %c0_i32_1 = arith.constant 0 : i32
    return %c0_i32, %c0_i32_0 : i32, i32
  }
  func.func @transform_2(%arg0: i32) -> (i32, i32) {
    %c0_i32 = arith.constant 0 : i32
    %c0_i32_0 = arith.constant 0 : i32
    %c0_i32_1 = arith.constant 0 : i32
    return %c0_i32, %c0_i32_0 : i32, i32
  }
  func.func @transform_3(%arg0: i32) -> (i32, i32) {
    %c0_i32 = arith.constant 0 : i32
    %c0_i32_0 = arith.constant 0 : i32
    %c0_i32_1 = arith.constant 0 : i32
    return %c0_i32, %c0_i32_0 : i32, i32
  }
  func.func @transform_4(%arg0: i32) -> (i32, i32) {
    %c0_i32 = arith.constant 0 : i32
    %c0_i32_0 = arith.constant 0 : i32
    %c0_i32_1 = arith.constant 0 : i32
    return %c0_i32, %c0_i32_0 : i32, i32
  }
  func.func @transform_5(%arg0: i32) -> (i32, i32) {
    %c0_i32 = arith.constant 0 : i32
    %c0_i32_0 = arith.constant 0 : i32
    return %arg0, %c0_i32 : i32, i32
  }
}

</mosaic_0001>

<bundles_post_ra>
// kernel: nonlinear_type_forward.1
= control target key start
LH: loop header
LB: loop body
LE: loop exit
PB: predicated region body
PF: predicated region fallthrough
CT: control target
= control target key end

     0   :  { %v1745_v0 = vmov 0   ;;  %v1746_v2 = vmov 2   ;;  %v1747_v22 = vmov 1   ;;  %vm1749_vm12 = vmmov 0   ;;  %s2917_s0 = inlined_call_operand.vmem [shape: f32[8,3], index: 0, kind: input, shape index: {}]   ;;  %s2918_s3 = inlined_call_operand.vmem [shape: f32[1600,128], index: 3, kind: input, shape index: {}]   ;;  %s2919_s1 = inlined_call_operand.vmem [shape: f32[3,1600], index: 1, kind: input, shape index: {}]   ;;  %s2920_s2 = inlined_call_operand.vmem [shape: f32[1,1600], index: 2, kind: input, shape index: {}]   ;;  %s2921_s4 = inlined_call_operand.vmem [shape: f32[1,128], index: 4, kind: input, shape index: {}]   ;;  %s2922_s5 = inlined_call_operand.vmem [shape: f32[8,128], index: 5, kind: output, shape index: {}]  }
   0x1   :  { %1741 = vset.pattern.permute.xlu0 %v1745_v0  ;;  %v20_v1 = vld [vmem:[%s2917_s0] sm:$0xff]  ;;  %1743 = vset.pattern.permute.xlu1 %v1746_v2  ;;  %v602_v4 = vld [vmem:[%s2918_s3 + $0x88] sm:$0xff]  ;;  %v603_v15 = vld [vmem:[%s2918_s3 + $0x90] sm:$0xff]  ;;  %vm792_vm14 = vcmask 523264  }
   0x2   :  { %v601_v3 = vld [vmem:[%s2918_s3 + $0x80] sm:$0xff]  ;;  %30 = vperm.xlu0 %1741, %v20_v1   ;;  %318 = vperm.xlu1 %1743, %v20_v1   ;;  %v634_v7 = vld [vmem:[%s2918_s3 + $0x188] sm:$0xff]  ;;  %v604_v16 = vld [vmem:[%s2918_s3 + $0x98] sm:$0xff] }
   0x3   :  { %v1531_v5 = vpack.c.bf16 %v602_v4, %v601_v3  ;;  %v633_v6 = vld [vmem:[%s2918_s3 + $0x180] sm:$0xff]  ;;  %v586_v10 = vld [vmem:[%s2918_s3 + $0x8] sm:$0xff]  ;;  %v635_v17 = vld [vmem:[%s2918_s3 + $0x190] sm:$0xff]  ;;  %v1535_v18 = vpack.c.bf16 %v604_v16, %v603_v15 }
   0x4   :  { %v585_v8 = vld [vmem:[%s2918_s3] sm:$0xff]  ;;  %v1563_v9 = vpack.c.bf16 %v634_v7, %v633_v6  ;;  %v618_v12 = vld [vmem:[%s2918_s3 + $0x108] sm:$0xff]  ;;  %v636_v19 = vld [vmem:[%s2918_s3 + $0x198] sm:$0xff] }
   0x5   :  { %v617_v11 = vld [vmem:[%s2918_s3 + $0x100] sm:$0xff]  ;;  %1532 = vmatprep.subr.bf16.mxu0 %v1531_v5  ;;  %v1533_v13 = vpack.c.bf16 %v586_v10, %v585_v8  ;;  %v587_v20 = vld [vmem:[%s2918_s3 + $0x10] sm:$0xff]  ;;  %v588_v21 = vld [vmem:[%s2918_s3 + $0x18] sm:$0xff]  ;;  %v1567_v23 = vpack.c.bf16 %v636_v19, %v635_v17 }
   0x6   :  { %v1565_v14 = vpack.c.bf16 %v618_v12, %v617_v11  ;;  %1564 = vmatprep.subr.bf16.mxu1 %v1563_v9  ;;  %1742 = vset.pattern.permute.xlu0 %v1747_v22  ;;  %v1537_v24 = vpack.c.bf16 %v588_v21, %v587_v20  ;;  %v619_v25 = vld [vmem:[%s2918_s3 + $0x110] sm:$0xff]  ;;  %v620_v26 = vld [vmem:[%s2918_s3 + $0x118] sm:$0xff]  ;;  %v605_v27 = vld [vmem:[%s2918_s3 + $0xa0] sm:$0xff] }
   0x7   :  { %1534 = vmatpush3.bf16.msra.mxu0 %v1533_v13  ;;  %171 = vperm.xlu0 %1742, %v20_v1   ;;  %v1569_v28 = vpack.c.bf16 %v620_v26, %v619_v25  ;;  %v606_v29 = vld [vmem:[%s2918_s3 + $0xa8] sm:$0xff]  ;;  %v637_v30 = vld [vmem:[%s2918_s3 + $0x1a0] sm:$0xff]  ;;  %v607_v38 = vld [vmem:[%s2918_s3 + $0xb0] sm:$0xff] }
   0x8   :  { %1566 = vmatpush3.bf16.msra.mxu1 %v1565_v14  ;;  %v638_v31 = vld [vmem:[%s2918_s3 + $0x1a8] sm:$0xff]  ;;  %1536 = vmatprep.subr.bf16.mxu0 %v1535_v18  ;;  %v1539_v32 = vpack.c.bf16 %v606_v29, %v605_v27  ;;  %v589_v34 = vld [vmem:[%s2918_s3 + $0x20] sm:$0xff]  ;;  %v608_v39 = vld [vmem:[%s2918_s3 + $0xb8] sm:$0xff] }
   0x9   :  { %1568 = vmatprep.subr.bf16.mxu1 %v1567_v23  ;;  %v1571_v33 = vpack.c.bf16 %v638_v31, %v637_v30  ;;  %v590_v35 = vld [vmem:[%s2918_s3 + $0x28] sm:$0xff]  ;;  %v621_v36 = vld [vmem:[%s2918_s3 + $0x120] sm:$0xff]  ;;  %v639_v41 = vld [vmem:[%s2918_s3 + $0x1b0] sm:$0xff]  ;;  %v1543_v44 = vpack.c.bf16 %v608_v39, %v607_v38 }
   0xa   :  { %v622_v37 = vld [vmem:[%s2918_s3 + $0x128] sm:$0xff]  ;;  %v1541_v40 = vpack.c.bf16 %v590_v35, %v589_v34  ;;  %v640_v42 = vld [vmem:[%s2918_s3 + $0x1b8] sm:$0xff]  ;;  %v591_v45 = vld [vmem:[%s2918_s3 + $0x30] sm:$0xff] }
   0xb   :  { %1538 = vmatpush3.bf16.msra.mxu0 %v1537_v24  ;;  %v1573_v43 = vpack.c.bf16 %v622_v37, %v621_v36  ;;  %v592_v46 = vld [vmem:[%s2918_s3 + $0x38] sm:$0xff]  ;;  %v623_v47 = vld [vmem:[%s2918_s3 + $0x130] sm:$0xff]  ;;  %v1575_v48 = vpack.c.bf16 %v640_v42, %v639_v41  ;;  %v609_v50 = vld [vmem:[%s2918_s3 + $0xc0] sm:$0xff]  ;;  %1744 = vset.pattern.permute.xlu0 %v1746_v2  ;;  %v40_v42 = vlaneseq }
   0xc   :  { %1570 = vmatpush3.bf16.msra.mxu1 %v1569_v28  ;;  %1540 = vmatprep.subr.bf16.mxu0 %v1539_v32  ;;  %v624_v49 = vld [vmem:[%s2918_s3 + $0x138] sm:$0xff]  ;;  %v610_v51 = vld [vmem:[%s2918_s3 + $0xc8] sm:$0xff]  ;;  %v641_v52 = vld [vmem:[%s2918_s3 + $0x1c0] sm:$0xff]  ;;  %v1545_v54 = vpack.c.bf16 %v592_v46, %v591_v45 }
   0xd   :  { %1572 = vmatprep.subr.bf16.mxu1 %v1571_v33  ;;  %v642_v53 = vld [vmem:[%s2918_s3 + $0x1c8] sm:$0xff]  ;;  %v1577_v55 = vpack.c.bf16 %v624_v49, %v623_v47  ;;  %v1547_v56 = vpack.c.bf16 %v610_v51, %v609_v50  ;;  %v593_v57 = vld [vmem:[%s2918_s3 + $0x40] sm:$0xff]  ;;  %v611_v62 = vld [vmem:[%s2918_s3 + $0xd0] sm:$0xff] }
   0xe   :  { %v594_v58 = vld [vmem:[%s2918_s3 + $0x48] sm:$0xff]  ;;  %v625_v59 = vld [vmem:[%s2918_s3 + $0x140] sm:$0xff]  ;;  %v1579_v60 = vpack.c.bf16 %v642_v53, %v641_v52  ;;  %v612_v63 = vld [vmem:[%s2918_s3 + $0xd8] sm:$0xff] }
   0xf   :  { %1542 = vmatpush3.bf16.msra.mxu0 %v1541_v40  ;;  %v626_v61 = vld [vmem:[%s2918_s3 + $0x148] sm:$0xff]  ;;  %v643_v0 = vld [vmem:[%s2918_s3 + $0x1d0] sm:$0xff]  ;;  %v644_v1 = vld [vmem:[%s2918_s3 + $0x1d8] sm:$0xff]  ;;  %v1549_v2 = vpack.c.bf16 %v594_v58, %v593_v57  ;;  %v1551_v4 = vpack.c.bf16 %v612_v63, %v611_v62 }
  0x10   :  { %1574 = vmatpush3.bf16.msra.mxu1 %v1573_v43  ;;  %1544 = vmatprep.subr.bf16.mxu0 %v1543_v44  ;;  %v1581_v3 = vpack.c.bf16 %v626_v61, %v625_v59  ;;  %v595_v5 = vld [vmem:[%s2918_s3 + $0x50] sm:$0xff]  ;;  %v596_v6 = vld [vmem:[%s2918_s3 + $0x58] sm:$0xff]  ;;  %v1583_v8 = vpack.c.bf16 %v644_v1, %v643_v0  ;;  %v613_v10 = vld [vmem:[%s2918_s3 + $0xe0] sm:$0xff]  ;;  %v1990_v43 = vshrl.u32 %v40_v42, 7 }
  0x11   :  { %1576 = vmatprep.subr.bf16.mxu1 %v1575_v48  ;;  %v627_v7 = vld [vmem:[%s2918_s3 + $0x150] sm:$0xff]  ;;  %v628_v9 = vld [vmem:[%s2918_s3 + $0x158] sm:$0xff]  ;;  %v614_v11 = vld [vmem:[%s2918_s3 + $0xe8] sm:$0xff]  ;;  %v1553_v14 = vpack.c.bf16 %v596_v6, %v595_v5 }
  0x12   :  { %v645_v12 = vld [vmem:[%s2918_s3 + $0x1e0] sm:$0xff]  ;;  %v646_v13 = vld [vmem:[%s2918_s3 + $0x1e8] sm:$0xff]  ;;  %v1585_v15 = vpack.c.bf16 %v628_v9, %v627_v7  ;;  %v1555_v16 = vpack.c.bf16 %v614_v11, %v613_v10  ;;  %v615_v22 = vld [vmem:[%s2918_s3 + $0xf0] sm:$0xff]  ;;  %2953 = vst [vmem:[#allocation2_spill] sm:$0xff] %v1990_v43  ;;  %v1993_v44 = vsub.s32 0, %v1990_v43  ;;  %v1996_v45 = vsub.s32 1, %v1990_v43 }
  0x13   :  { %1546 = vmatpush3.bf16.msra.mxu0 %v1545_v54  ;;  %v597_v17 = vld [vmem:[%s2918_s3 + $0x60] sm:$0xff]  ;;  %v598_v18 = vld [vmem:[%s2918_s3 + $0x68] sm:$0xff]  ;;  %v1587_v20 = vpack.c.bf16 %v646_v13, %v645_v12  ;;  %v616_v23 = vld [vmem:[%s2918_s3 + $0xf8] sm:$0xff]  ;;  %v1999_v46 = vsub.s32 2, %v1990_v43  ;;  %v2017_v54 = vsub.s32 4, %v1990_v43  ;;  %v2026_v57 = vsub.s32 6, %v1990_v43 }
  0x14   :  { %1578 = vmatpush3.bf16.msra.mxu1 %v1577_v55  ;;  %1548 = vmatprep.subr.bf16.mxu0 %v1547_v56  ;;  %v629_v19 = vld [vmem:[%s2918_s3 + $0x160] sm:$0xff]  ;;  %v630_v21 = vld [vmem:[%s2918_s3 + $0x168] sm:$0xff]  ;;  %v647_v24 = vld [vmem:[%s2918_s3 + $0x1f0] sm:$0xff]  ;;  %v1557_v26 = vpack.c.bf16 %v598_v18, %v597_v17  ;;  %v1559_v28 = vpack.c.bf16 %v616_v23, %v615_v22  ;;  %v2020_v55 = vsub.s32 5, %v1990_v43  ;;  %v2923_v61 = vsub.s32 3, %v1990_v43 }
  0x15   :  { %1580 = vmatprep.subr.bf16.mxu1 %v1579_v60  ;;  %v648_v25 = vld [vmem:[%s2918_s3 + $0x1f8] sm:$0xff]  ;;  %v1589_v27 = vpack.c.bf16 %v630_v21, %v629_v19  ;;  %v599_v29 = vld [vmem:[%s2918_s3 + $0x70] sm:$0xff]  ;;  %v665_v34 = vld [vmem:[%s2918_s3 + $0x280] sm:$0xff]  ;;  %2957 = vst [vmem:[#allocation6_spill] sm:$0xff] %v2026_v57 }
  0x16   :  { %v600_v30 = vld [vmem:[%s2918_s3 + $0x78] sm:$0xff]  ;;  %v631_v31 = vld [vmem:[%s2918_s3 + $0x170] sm:$0xff]  ;;  %v1591_v32 = vpack.c.bf16 %v648_v25, %v647_v24  ;;  %v666_v35 = vld [vmem:[%s2918_s3 + $0x288] sm:$0xff] }
  0x17   :  { %1550 = vmatpush3.bf16.msra.mxu0 %v1549_v2  ;;  %v632_v33 = vld [vmem:[%s2918_s3 + $0x178] sm:$0xff]  ;;  %v697_v36 = vld [vmem:[%s2918_s3 + $0x380] sm:$0xff]  ;;  %v698_v37 = vld [vmem:[%s2918_s3 + $0x388] sm:$0xff]  ;;  %v1561_v38 = vpack.c.bf16 %v600_v30, %v599_v29  ;;  %v1595_v40 = vpack.c.bf16 %v666_v35, %v665_v34 }
  0x18   :  { %1582 = vmatpush3.bf16.msra.mxu1 %v1581_v3  ;;  %1552 = vmatprep.subr.bf16.mxu0 %v1551_v4  ;;  %v1593_v39 = vpack.c.bf16 %v632_v33, %v631_v31  ;;  %v1627_v41 = vpack.c.bf16 %v698_v37, %v697_v36  ;;  %v27_v47 = vld [vmem:[%s2919_s1 + $0x30] sm:$0x7]  ;;  %v21_v56 = vld [vmem:[%s2919_s1] sm:$0x77]  ;;  %v22_v58 = vld [vmem:[%s2919_s1 + $0x8] sm:$0x77] }
  0x19   :  { %1584 = vmatprep.subr.bf16.mxu1 %v1583_v8  ;;  %v91_v48 = vrot.slane %v27_v47, %v1993_v44  ;;  %v225_v49 = vrot.slane %v27_v47, %v1996_v45  ;;  %v372_v50 = vrot.slane %v27_v47, %v1999_v46  ;;  %v47_v59 = vrot.slane %v21_v56, %v2017_v54  ;;  %v2038_v63 = vld [vmem:[%s2920_s2] sm:$0xff]  ;;  %v2061_v9 = vld [vmem:[%s2919_s1 + $0x10] sm:$0x77]  ;;  %v2108_v25 = vld [vmem:[%s2918_s3 + $0x308] sm:$0xff] }
  0x1a   :  { %v181_v60 = vrot.slane %v21_v56, %v2020_v55  ;;  %v328_v62 = vrot.slane %v21_v56, %v2026_v57  ;;  %v55_v0 = vrot.slane %v22_v58, %v2017_v54  ;;  %v189_v1 = vrot.slane %v22_v58, %v2020_v55  ;;  %v2085_v19 = vld [vmem:[%s2918_s3 + $0x200] sm:$0xff]  ;;  %v2133_v33 = vld [vmem:[%s2918_s3 + $0x390] sm:$0xff]  ;;  %v2138_v34 = vld [vmem:[%s2918_s3 + $0x398] sm:$0xff] }
  0x1b   :  { %1554 = vmatpush3.bf16.msra.mxu0 %v1553_v14  ;;  %v2008_v51 = vrot.slane %v91_v48, %v1993_v44  ;;  %v2011_v52 = vrot.slane %v225_v49, %v1996_v45  ;;  %v2014_v53 = vrot.slane %v372_v50, %v1999_v46  ;;  %v336_v2 = vrot.slane %v22_v58, %v2026_v57  ;;  %v2074_v14 = vld [vmem:[%s2919_s1 + $0x18] sm:$0x77]  ;;  %v2095_v21 = vld [vmem:[%s2918_s3 + $0x300] sm:$0xff]  ;;  %v2143_v35 = vld [vmem:[%s2918_s3 + $0x210] sm:$0xff] }
  0x1c   :  { %1586 = vmatpush3.bf16.msra.mxu1 %v1585_v15  ;;  %1556 = vmatprep.subr.bf16.mxu0 %v1555_v16  ;;  %v43_v3 = vrot.slane %v21_v56, %v1993_v44  ;;  %v498_v4 = vsub.s32 7, %v1990_v43  ;;  %v2046_v5 = vrot.slane %v47_v59, %v1993_v44  ;;  %v2049_v6 = vrot.slane %v181_v60, %v1996_v45  ;;  %v2148_v36 = vld [vmem:[%s2918_s3 + $0x218] sm:$0xff]  ;;  %v2173_v47 = vld [vmem:[%s2918_s3 + $0x2a0] sm:$0xff]  ;;  %v2178_v48 = vld [vmem:[%s2918_s3 + $0x2a8] sm:$0xff] }
  0x1d   :  { %1588 = vmatprep.subr.bf16.mxu1 %v1587_v20  ;;  %2954 = vst [vmem:[#allocation3_spill] sm:$0xff] %v2008_v51  ;;  %2955 = vst [vmem:[#allocation4_spill] sm:$0xff] %v2011_v52  ;;  %v2056_v8 = vrot.slane %v2038_v63, %v2923_v61  ;;  %v2064_v10 = vrot.slane %v328_v62, %v1999_v46  ;;  %v2067_v11 = vrot.slane %v55_v0, %v1993_v44  ;;  %v2090_v20 = vld [vmem:[%s2918_s3 + $0x208] sm:$0xff]  ;;  %v2168_v42 = vld [vmem:[%s2918_s3 + $0x318] sm:$0xff] }
  0x1e   :  { %2956 = vst [vmem:[#allocation5_spill] sm:$0xff] %v2014_v53  ;;  %v177_v12 = vrot.slane %v21_v56, %v1996_v45  ;;  %v324_v13 = vrot.slane %v21_v56, %v1999_v46  ;;  %v2077_v15 = vrot.slane %v189_v1, %v1996_v45  ;;  %v51_v16 = vrot.slane %v22_v58, %v1993_v44  ;;  %v2194_v59 = vld [vmem:[%s2918_s3 + $0x3a0] sm:$0xff]  ;;  %v2199_v60 = vld [vmem:[%s2918_s3 + $0x3a8] sm:$0xff]  ;;  %v2254_v61 = vld [vmem:[%s2918_s3 + $0x230] sm:$0xff] }
  0x1f   :  { %1558 = vmatpush3.bf16.msra.mxu0 %v1557_v26  ;;  %v185_v17 = vrot.slane %v22_v58, %v1996_v45  ;;  %v332_v18 = vrot.slane %v22_v58, %v1999_v46  ;;  %v2098_v22 = vrot.slane %v336_v2, %v1999_v46  ;;  %v2101_v23 = vrot.slane %v43_v3, %v1993_v44  ;;  %v2204_v62 = vld [vmem:[%s2918_s3 + $0x220] sm:$0xff]  ;;  %v2209_v0 = vld [vmem:[%s2918_s3 + $0x228] sm:$0xff]  ;;  %v2259_v3 = vld [vmem:[%s2918_s3 + $0x238] sm:$0xff] }
  0x20   :  { %1590 = vmatpush3.bf16.msra.mxu1 %v1589_v27  ;;  %1560 = vmatprep.subr.bf16.mxu0 %v1559_v28  ;;  %v63_v26 = vrot.slane %v2061_v9, %v2017_v54  ;;  %v2115_v27 = vld [vmem:[%s2918_s3 + $0x290] sm:$0xff]  ;;  %v2120_v28 = vld [vmem:[%s2918_s3 + $0x298] sm:$0xff]  ;;  %v197_v30 = vrot.slane %v2061_v9, %v2020_v55  ;;  %v344_v31 = vrot.slane %v2061_v9, %v2026_v57  ;;  %v2214_v1 = vld [vmem:[%s2918_s3 + $0x320] sm:$0xff] }
  0x21   :  { %1592 = vmatprep.subr.bf16.mxu1 %v1591_v32  ;;  %2958 = vst [vmem:[#allocation7_spill] sm:$0xff] %v2115_v27  ;;  %v71_v32 = vrot.slane %v2074_v14, %v2017_v54  ;;  %2959 = vst [vmem:[#allocation8_spill] sm:$0xff] %v2133_v33  ;;  %v2151_v37 = vrot.slane %v177_v12, %v1996_v45  ;;  %v2181_v49 = vrot.slane %v51_v16, %v1993_v44  ;;  %v2219_v2 = vld [vmem:[%s2918_s3 + $0x328] sm:$0xff]  ;;  %v2264_v58 = vld [vmem:[%s2918_s3 + $0x330] sm:$0xff] }
  0x22   :  { %2960 = vst [vmem:[#allocation9_spill] sm:$0xff] %v2143_v35  ;;  %2961 = vst [vmem:[#allocation10_spill] sm:$0xff] %v2148_v36  ;;  %v2184_v50 = vrot.slane %v185_v17, %v1996_v45  ;;  %v2187_v56 = vrot.slane %v332_v18, %v1999_v46  ;;  %v2224_v12 = vrot.slane %v63_v26, %v1993_v44  ;;  %v2234_v17 = vld [vmem:[%s2918_s3 + $0x2b0] sm:$0xff]  ;;  %v2239_v18 = vld [vmem:[%s2918_s3 + $0x2b8] sm:$0xff] }
  0x23   :  { %1562 = vmatpush3.bf16.msra.mxu0 %v1561_v38  ;;  %v2154_v38 = vrot.slane %v324_v13, %v1999_v46  ;;  %2963 = vst [vmem:[#allocation12_spill] sm:$0xff] %v2168_v42  ;;  %2964 = vst [vmem:[#allocation13_spill] sm:$0xff] %v2173_v47  ;;  %v2229_v16 = vrot.slane %v2038_v63, %v498_v4  ;;  %v2244_v26 = vld [vmem:[%s2918_s3 + $0x3b0] sm:$0xff]  ;;  %v2249_v4 = vld [vmem:[%s2918_s3 + $0x3b8] sm:$0xff]  ;;  %v2272_v29 = vrot.slane %v197_v30, %v1996_v45 }
  0x24   :  { %1594 = vmatpush3.bf16.msra.mxu1 %v1593_v39  ;;  %1596 = vmatprep.subr.bf16.mxu0 %v1595_v40  ;;  %v205_v39 = vrot.slane %v2074_v14, %v2020_v55  ;;  %v352_v40 = vrot.slane %v2074_v14, %v2026_v57  ;;  %2965 = vst [vmem:[#allocation14_spill] sm:$0xff] %v2178_v48  ;;  %2966 = vst [vmem:[#allocation15_spill] sm:$0xff] %v2194_v59  ;;  %v2269_v13 = vld [vmem:[%s2918_s3 + $0x338] sm:$0xff]  ;;  %v2283_v53 = vld [vmem:[%s2918_s3 + $0x2c0] sm:$0xff] }
  0x25   :  { %1628 = vmatprep.subr.bf16.mxu1 %v1627_v41  ;;  %v2163_v41 = vld [vmem:[%s2918_s3 + $0x310] sm:$0xff]  ;;  %2967 = vst [vmem:[#allocation16_spill] sm:$0xff] %v2199_v60  ;;  %2968 = vst [vmem:[#allocation17_spill] sm:$0xff] %v2204_v62  ;;  %v409_v24 = vrot.slane %v344_v31, %v1999_v46  ;;  %v2276_v7 = vrot.slane %v71_v32, %v1993_v44  ;;  %v2288_v52 = vld [vmem:[%s2918_s3 + $0x2c8] sm:$0xff]  ;;  %v193_v57 = vrot.slane %v2061_v9, %v1996_v45 }
  0x26   :  { %2962 = vst [vmem:[#allocation11_spill] sm:$0xff] %v2163_v41  ;;  %2969 = vst [vmem:[#allocation18_spill] sm:$0xff] %v2209_v0  ;;  %v2293_v30 = vld [vmem:[%s2918_s3 + $0x3c0] sm:$0xff]  ;;  %v270_v31 = vrot.slane %v205_v39, %v1996_v45  ;;  %v417_v32 = vrot.slane %v352_v40, %v1999_v46  ;;  %v2304_v51 = vld [vmem:[%s2918_s3 + $0x3c8] sm:$0xff]  ;;  %v59_v40 = vrot.slane %v2061_v9, %v1993_v44 }
  0x27   :  { %2970 = vst [vmem:[#allocation19_spill] sm:$0xff] %v2214_v1  ;;  %2971 = vst [vmem:[#allocation20_spill] sm:$0xff] %v2219_v2  ;;  %v2309_v27 = vld [vmem:[%s2918_s3 + $0x240] sm:$0xff]  ;;  %v2314_v39 = vld [vmem:[%s2918_s3 + $0x248] sm:$0xff]  ;;  %v340_v48 = vrot.slane %v2061_v9, %v1999_v46  ;;  %v2395_v9 = vrot.slane %v193_v57, %v1996_v45 }
  0x28   :  { %2972 = vst [vmem:[#allocation21_spill] sm:$0xff] %v2283_v53  ;;  %2973 = vst [vmem:[#allocation22_spill] sm:$0xff] %v2288_v52  ;;  %v2323_v43 = vld [vmem:[%s2918_s3 + $0x340] sm:$0xff]  ;;  %v2328_v35 = vld [vmem:[%s2918_s3 + $0x348] sm:$0xff]  ;;  %v2392_v53 = vrot.slane %v59_v40, %v1993_v44 }
  0x29   :  { %2974 = vst [vmem:[#allocation23_spill] sm:$0xff] %v2293_v30  ;;  %2975 = vst [vmem:[#allocation24_spill] sm:$0xff] %v2304_v51  ;;  %v2333_v36 = vld [vmem:[%s2918_s3 + $0x2d0] sm:$0xff]  ;;  %v2348_v42 = vld [vmem:[%s2918_s3 + $0x2d8] sm:$0xff]  ;;  %v2398_v41 = vrot.slane %v340_v48, %v1999_v46 }
  0x2a   :  { %2976 = vst [vmem:[#allocation25_spill] sm:$0xff] %v2309_v27  ;;  %2977 = vst [vmem:[#allocation26_spill] sm:$0xff] %v2314_v39  ;;  %v2353_v33 = vld [vmem:[%s2918_s3 + $0x3d0] sm:$0xff]  ;;  %v2358_v47 = vld [vmem:[%s2918_s3 + $0x3d8] sm:$0xff] }
  0x2b   :  { %2978 = vst [vmem:[#allocation27_spill] sm:$0xff] %v2323_v43  ;;  %2979 = vst [vmem:[#allocation28_spill] sm:$0xff] %v2328_v35  ;;  %v2385_v62 = vld [vmem:[%s2919_s1 + $0x20] sm:$0x77] }
  0x2c   :  { %2980 = vst [vmem:[#allocation29_spill] sm:$0xff] %v2333_v36  ;;  %2981 = vst [vmem:[#allocation30_spill] sm:$0xff] %v2348_v42  ;;  %v75_v57 = vrot.slane %v2385_v62, %v1993_v44  ;;  %v209_v48 = vrot.slane %v2385_v62, %v1996_v45 }
  0x2d   :  { %2982 = vst [vmem:[#allocation31_spill] sm:$0xff] %v2353_v33  ;;  %2983 = vst [vmem:[#allocation32_spill] sm:$0xff] %v2358_v47 }
  0x2e   :  { %2984 = vst [vmem:[#allocation33_spill] sm:$0xff] %v2392_v53  ;;  %2985 = vst [vmem:[#allocation34_spill] sm:$0xff] %v2398_v41  ;;  %v356_v41 = vrot.slane %v2385_v62, %v1999_v46 }
  0x81   :  { %v2370_v0 = vpop.permute.xlu0 %30  ;;  %v2372_v59 = vpop.permute.xlu1 %318 }
  0x82   :  { %v158_v60 = vmul.f32 %v2046_v5, %v2370_v0  ;;  %v439_v40 = vmul.f32 %v2064_v10, %v2372_v59  ;;  %v160_v1 = vmul.f32 %v2067_v11, %v2370_v0  ;;  %v441_v43 = vmul.f32 %v2098_v22, %v2372_v59 }
  0x83   :  { %v157_v2 = vmul.f32 %v2101_v23, %v2370_v0  ;;  %v438_v5 = vmul.f32 %v2154_v38, %v2372_v59  ;;  %v159_v10 = vmul.f32 %v2181_v49, %v2370_v0  ;;  %v440_v47 = vmul.f32 %v2187_v56, %v2372_v59  ;;  %v2442_v56 = vld [vmem:[%s2919_s1 + $0x28] sm:$0x77] }
  0x84   :  { %v162_v11 = vmul.f32 %v2224_v12, %v2370_v0  ;;  %v443_v36 = vmul.f32 %v409_v24, %v2372_v59  ;;  %v83_v30 = vrot.slane %v2442_v56, %v1993_v44 }
  0x86   :  { %v2422_v33 = vpop.permute.xlu0 %171 }
  0x87   :  { %v292_v22 = vmul.f32 %v2049_v6, %v2422_v33  ;;  %v294_v23 = vmul.f32 %v2077_v15, %v2422_v33  ;;  %v291_v38 = vmul.f32 %v2151_v37, %v2422_v33  ;;  %v293_v49 = vmul.f32 %v2184_v50, %v2422_v33 }
  0x88   :  { %v296_v24 = vmul.f32 %v2272_v29, %v2422_v33  ;;  %v164_v6 = vmul.f32 %v2276_v7, %v2370_v0  ;;  %v298_v12 = vmul.f32 %v270_v31, %v2422_v33  ;;  %v445_v15 = vmul.f32 %v417_v32, %v2372_v59 }
  0x89   :  { %v305_v42 = vadd.f32 %v292_v22, %v158_v60  ;;  %v307_v37 = vadd.f32 %v294_v23, %v160_v1  ;;  %v304_v35 = vadd.f32 %v291_v38, %v157_v2  ;;  %v306_v27 = vadd.f32 %v293_v49, %v159_v10  ;;  %v2477_v38 = vld [vmem:[%s2920_s2 + $0x8] sm:$0x1f] }
  0x8a   :  { %v309_v50 = vadd.f32 %v296_v24, %v162_v11  ;;  %v311_v39 = vadd.f32 %v298_v12, %v164_v6  ;;  %v140_v32 = vrot.slane %v75_v57, %v1993_v44  ;;  %v274_v60 = vrot.slane %v209_v48, %v1996_v45 }
  0x8b   :  { %v452_v29 = vadd.f32 %v439_v40, %v305_v42  ;;  %v454_v51 = vadd.f32 %v441_v43, %v307_v37  ;;  %v451_v52 = vadd.f32 %v438_v5, %v304_v35  ;;  %v453_v7 = vadd.f32 %v440_v47, %v306_v27 }
  0x8c   :  { %v456_v53 = vadd.f32 %v443_v36, %v309_v50  ;;  %v458_v31 = vadd.f32 %v445_v15, %v311_v39  ;;  %v2986_v1 = vrot.slane %v2038_v63, %v1996_v45  ;;  %v2987_v11 = vrot.slane %v2038_v63, %v1993_v44 }
  0x8d   :  { %v536_v10 = vadd.f32 %v2056_v8, %v454_v51  ;;  %v2988_v43 = vrot.slane %v2038_v63, %v1999_v46  ;;  %v2989_v35 = vrot.slane %v2038_v63, %v2020_v55  ;;  %v217_v47 = vrot.slane %v2442_v56, %v1996_v45 }
  0x8e   :  { %v534_v2 = vadd.f32 %v2986_v1, %v452_v29  ;;  %v533_v22 = vadd.f32 %v2987_v11, %v451_v52  ;;  %v540_v42 = vadd.f32 %v2229_v16, %v458_v31  ;;  %v364_v51 = vrot.slane %v2442_v56, %v1999_v46 }
  0x8f   :  { %v535_v27 = vadd.f32 %v2988_v43, %v453_v7  ;;  %v538_v36 = vadd.f32 %v2989_v35, %v456_v53  ;;  %vm549_vm1 = vcmp.gt.f32.partialorder %v536_v10, 0.0  ;;  %v562_v52 = vmul.f32 0.01, %v536_v10  ;;  %v3001_v35 = vld [vmem:[#allocation11_spill] sm:$0xff] }
  0x90   :  { %vm547_vm0 = vcmp.gt.f32.partialorder %v534_v2, 0.0  ;;  %v560_v8 = vmul.f32 0.01, %v534_v2  ;;  %vm546_vm2 = vcmp.gt.f32.partialorder %v533_v22, 0.0  ;;  %v559_v39 = vmul.f32 0.01, %v533_v22 }
  0x91   :  { %vm548_vm3 = vcmp.gt.f32.partialorder %v535_v27, 0.0  ;;  %v561_v40 = vmul.f32 0.01, %v535_v27  ;;  %v575_v48 = vsel %vm549_vm1, %v536_v10, %v562_v52  ;;  %vm551_vm4 = vcmp.gt.f32.partialorder %v538_v36, 0.0  ;;  %v3004_v52 = vld [vmem:[#allocation13_spill] sm:$0xff] }
  0x92   :  { %v573_v57 = vsel %vm547_vm0, %v534_v2, %v560_v8  ;;  %v564_v53 = vmul.f32 0.01, %v538_v36  ;;  %930 = vmatprep.mubr.f32.mxu1 %v575_v48  ;;  %v572_v16 = vsel %vm546_vm2, %v533_v22, %v559_v39  ;;  %vm553_vm5 = vcmp.gt.f32.partialorder %v540_v42, 0.0  ;;  %v2998_v22 = vld [vmem:[#allocation9_spill] sm:$0xff]  ;;  %v3003_v8 = vld [vmem:[#allocation14_spill] sm:$0xff] }
  0x93   :  { %860 = vmatprep.mubr.f32.mxu0 %v573_v57  ;;  %v574_v5 = vsel %vm548_vm3, %v535_v27, %v561_v40  ;;  %v566_v23 = vmul.f32 0.01, %v540_v42  ;;  %v421_v49 = vrot.slane %v356_v41, %v1999_v46  ;;  %v148_v24 = vrot.slane %v83_v30, %v1993_v44  ;;  %v3000_v27 = vld [vmem:[#allocation12_spill] sm:$0xff]  ;;  %v3007_v57 = vld [vmem:[#allocation15_spill] sm:$0xff] }
  0x94   :  { %861 = vmatmul.mubr.f32.vlgmr.msra.gmra.mrb[0].mxu0 %v572_v16  ;;  %931 = vmatmul.mubr.f32.vlgmr.msra.gmra.mrb[0].mxu1 %v574_v5  ;;  %v282_v6 = vrot.slane %v217_v47, %v1996_v45  ;;  %v2990_v12 = vpack.c.bf16 %v2090_v20, %v2085_v19  ;;  %v2991_v15 = vpack.c.bf16 %v2108_v25, %v2095_v21  ;;  %v2992_v19 = vld [vmem:[#allocation7_spill] sm:$0xff]  ;;  %v2994_v21 = vld [vmem:[#allocation8_spill] sm:$0xff] }
  0x95   :  { %v577_v37 = vsel %vm551_vm4, %v538_v36, %v564_v53  ;;  %v579_v50 = vsel %vm553_vm5, %v540_v42, %v566_v23  ;;  %v429_v29 = vrot.slane %v364_v51, %v1999_v46  ;;  %v79_v41 = vrot.slane %v2385_v62, %v2017_v54  ;;  %v3006_v40 = vld [vmem:[#allocation16_spill] sm:$0xff]  ;;  %v3009_v5 = vld [vmem:[#allocation3_spill] sm:$0xff] }
  0x96   :  { %1598 = vmatpush3.bf16.msra.mxu0 %v2990_v12  ;;  %1630 = vmatpush3.bf16.msra.mxu1 %v2991_v15  ;;  %v165_v30 = vmul.f32 %v140_v32, %v2370_v0  ;;  %v299_v7 = vmul.f32 %v274_v60, %v2422_v33  ;;  %v2993_v20 = vpack.c.bf16 %v2120_v28, %v2992_v19  ;;  %v3012_v15 = vld [vmem:[#allocation5_spill] sm:$0xff]  ;;  %v3013_v19 = vld [vmem:[#allocation18_spill] sm:$0xff] }
  0x97   :  { %1000 = vmatprep.mubr.f32.mxu0 %v577_v37  ;;  %1070 = vmatprep.mubr.f32.mxu1 %v579_v50  ;;  %v2995_v25 = vpack.c.bf16 %v2138_v34, %v2994_v21  ;;  %v2996_v31 = vrot.slane %v2074_v14, %v1996_v45  ;;  %v213_v2 = vrot.slane %v2385_v62, %v2020_v55  ;;  %v2997_v34 = vld [vmem:[#allocation10_spill] sm:$0xff]  ;;  %v3016_v21 = vld [vmem:[#allocation20_spill] sm:$0xff] }
  0x98   :  { %1600 = vmatprep.subr.bf16.mxu0 %v2993_v20  ;;  %v503_v32 = vrot.slane %v2477_v38, %v1993_v44  ;;  %v312_v60 = vadd.f32 %v299_v7, %v165_v30  ;;  %v446_v10 = vmul.f32 %v421_v49, %v2372_v59  ;;  %v167_v28 = vmul.f32 %v148_v24, %v2370_v0  ;;  %v3010_v49 = vld [vmem:[#allocation6_spill] sm:$0xff]  ;;  %v3014_v20 = vld [vmem:[#allocation17_spill] sm:$0xff] }
  0x99   :  { %1632 = vmatprep.subr.bf16.mxu1 %v2995_v25  ;;  %v266_v1 = vrot.slane %v2996_v31, %v1996_v45  ;;  %v301_v11 = vmul.f32 %v282_v6, %v2422_v33  ;;  %v2999_v43 = vpack.c.bf16 %v2997_v34, %v2998_v22  ;;  %v3002_v36 = vpack.c.bf16 %v3000_v27, %v3001_v35  ;;  %v3011_v6 = vld [vmem:[#allocation4_spill] sm:$0xff]  ;;  %v3017_v25 = vld [vmem:[#allocation19_spill] sm:$0xff] }
  0x9a   :  { %v221_v42 = vrot.slane %v2442_v56, %v2020_v55  ;;  %v448_v47 = vmul.f32 %v429_v29, %v2372_v59  ;;  %v511_v51 = vrot.slane %v2477_v38, %v1999_v46  ;;  %v3005_v39 = vpack.c.bf16 %v3003_v8, %v3004_v52 }
  0x9b   :  { %1602 = vmatpush3.bf16.msra.mxu0 %v2999_v43  ;;  %1634 = vmatpush3.bf16.msra.mxu1 %v3002_v36  ;;  %v3008_v48 = vpack.c.bf16 %v3006_v40, %v3007_v57  ;;  %v459_v53 = vadd.f32 %v446_v10, %v312_v60  ;;  %v314_v16 = vadd.f32 %v301_v11, %v167_v28  ;;  %v692_v40 = vld [vmem:[%s2918_s3 + $0x358] sm:$0xff]  ;;  %v3032_v57 = vld [vmem:[#allocation34_spill] sm:$0xff] }
  0x9c   :  { %1604 = vmatprep.subr.bf16.mxu0 %v3005_v39  ;;  %v169_v23 = vmul.f32 %v3009_v5, %v2370_v0  ;;  %v360_v55 = vrot.slane %v2385_v62, %v3010_v49  ;;  %v87_v24 = vrot.slane %v2442_v56, %v2017_v54  ;;  %v303_v12 = vmul.f32 %v3011_v6, %v2422_v33  ;;  %v691_v39 = vld [vmem:[%s2918_s3 + $0x350] sm:$0xff]  ;;  %v678_v5 = vld [vmem:[%s2918_s3 + $0x2e8] sm:$0xff] }
  0x9d   :  { %1636 = vmatprep.subr.bf16.mxu1 %v3008_v48  ;;  %v450_v37 = vmul.f32 %v3012_v15, %v2372_v59  ;;  %v278_v50 = vrot.slane %v213_v2, %v1996_v45  ;;  %v368_v29 = vrot.slane %v2442_v56, %v3010_v49  ;;  %v2541_v30 = vadd.f32 %v503_v32, %v459_v53 }
  0x9e   :  { %v461_v7 = vadd.f32 %v448_v47, %v314_v16  ;;  %v3015_v62 = vpack.c.bf16 %v3013_v19, %v3014_v20  ;;  %v3018_v31 = vpack.c.bf16 %v3016_v21, %v3017_v25  ;;  %v3019_v60 = vrot.slane %v2074_v14, %v1993_v44  ;;  %v3034_v19 = vld [vmem:[#allocation25_spill] sm:$0xff]  ;;  %v3037_v21 = vld [vmem:[#allocation27_spill] sm:$0xff] }
  0x9f   :  { %v144_v2 = vrot.slane %v79_v41, %v1993_v44  ;;  %v286_v56 = vrot.slane %v221_v42, %v1996_v45  ;;  %v3020_v32 = vpack.c.bf16 %v2239_v18, %v2234_v17  ;;  %v3021_v28 = vpack.c.bf16 %v2249_v4, %v2244_v26 }
  0xa0   :  { %1606 = vmatpush3.bf16.msra.mxu0 %v3015_v62  ;;  %1638 = vmatpush3.bf16.msra.mxu1 %v3018_v31  ;;  %v132_v10 = vrot.slane %v3019_v60, %v1993_v44  ;;  %v2561_v11 = vadd.f32 %v511_v51, %v461_v7  ;;  %v316_v34 = vadd.f32 %v303_v12, %v169_v23  ;;  %v3027_v51 = vld [vmem:[#allocation21_spill] sm:$0xff]  ;;  %v709_v23 = vld [vmem:[%s2918_s3 + $0x3e0] sm:$0xff]  ;;  %v3036_v62 = vld [vmem:[#allocation28_spill] sm:$0xff]  ;;  %vm554_vm10 = vcmp.gt.f32.partialorder %v2541_v30, 0.0 }
  0xa1   :  { %1608 = vmatprep.subr.bf16.mxu0 %v3020_v32  ;;  %1640 = vmatprep.subr.bf16.mxu1 %v3021_v28  ;;  %v519_v22 = vrot.slane %v2477_v38, %v2017_v54  ;;  %v295_v43 = vmul.f32 %v2395_v9, %v2422_v33  ;;  %v297_v41 = vmul.f32 %v266_v1, %v2422_v33  ;;  %v3025_v1 = vld [vmem:[#allocation33_spill] sm:$0xff]  ;;  %v3033_v7 = vld [vmem:[#allocation26_spill] sm:$0xff] }
  0xa2   :  { %v3022_v17 = vrot.slane %v2074_v14, %v1999_v46  ;;  %v152_v27 = vrot.slane %v87_v24, %v1993_v44  ;;  %v300_v26 = vmul.f32 %v278_v50, %v2422_v33  ;;  %v425_v4 = vrot.slane %v360_v55, %v1999_v46  ;;  %v659_v14 = vld [vmem:[%s2918_s3 + $0x250] sm:$0xff]  ;;  %v660_v44 = vld [vmem:[%s2918_s3 + $0x258] sm:$0xff]  ;;  %v710_v55 = vld [vmem:[%s2918_s3 + $0x3e8] sm:$0xff] }
  0xa3   :  { %v433_v35 = vrot.slane %v368_v29, %v1999_v46  ;;  %v463_v36 = vadd.f32 %v450_v37, %v316_v34  ;;  %v3023_v42 = vpack.c.bf16 %v2259_v3, %v2254_v61  ;;  %v3024_v9 = vpack.c.bf16 %v2269_v13, %v2264_v58  ;;  %v3026_v3 = vld [vmem:[#allocation22_spill] sm:$0xff]  ;;  %v3029_v58 = vld [vmem:[#allocation24_spill] sm:$0xff]  ;;  %v3030_v13 = vld [vmem:[#allocation23_spill] sm:$0xff] }
  0xa4   :  { %v413_v18 = vrot.slane %v3022_v17, %v1999_v46  ;;  %v161_v46 = vmul.f32 %v3025_v1, %v2370_v0  ;;  %v163_v47 = vmul.f32 %v132_v10, %v2370_v0  ;;  %v302_v61 = vmul.f32 %v286_v56, %v2422_v33  ;;  %v677_v33 = vld [vmem:[%s2918_s3 + $0x2e0] sm:$0xff]  ;;  %v3040_v32 = vld [vmem:[#allocation29_spill] sm:$0xff]  ;;  %v3042_v34 = vld [vmem:[#allocation32_spill] sm:$0xff] }
  0xa5   :  { %1610 = vmatpush3.bf16.msra.mxu0 %v3023_v42  ;;  %1642 = vmatpush3.bf16.msra.mxu1 %v3024_v9  ;;  %v3028_v8 = vpack.c.bf16 %v3026_v3, %v3027_v51  ;;  %v3031_v52 = vpack.c.bf16 %v3029_v58, %v3030_v13  ;;  %v442_v48 = vmul.f32 %v3032_v57, %v2372_v59  ;;  %v661_v60 = vld [vmem:[%s2918_s3 + $0x260] sm:$0xff]  ;;  %v695_v58 = vld [vmem:[%s2918_s3 + $0x370] sm:$0xff]  ;;  %v696_v13 = vld [vmem:[%s2918_s3 + $0x378] sm:$0xff]  ;;  %vm556_vm11 = vcmp.gt.f32.partialorder %v2561_v11, 0.0 }
  0xa6   :  { %v166_v53 = vmul.f32 %v144_v2, %v2370_v0  ;;  %v2610_v16 = vadd.f32 %v519_v22, %v463_v36  ;;  %v308_v24 = vadd.f32 %v295_v43, %v161_v46  ;;  %v310_v6 = vadd.f32 %v297_v41, %v163_v47  ;;  %v3039_v56 = vld [vmem:[#allocation30_spill] sm:$0xff]  ;;  %v3043_v22 = vld [vmem:[#allocation31_spill] sm:$0xff] }
  0xa7   :  { %1612 = vmatprep.subr.bf16.mxu0 %v3028_v8  ;;  %1644 = vmatprep.subr.bf16.mxu1 %v3031_v52  ;;  %v444_v12 = vmul.f32 %v413_v18, %v2372_v59  ;;  %v168_v15 = vmul.f32 %v152_v27, %v2370_v0  ;;  %v1617_v37 = vpack.c.bf16 %v660_v44, %v659_v14  ;;  %v662_v0 = vld [vmem:[%s2918_s3 + $0x268] sm:$0xff]  ;;  %v693_v18 = vld [vmem:[%s2918_s3 + $0x360] sm:$0xff] }
  0xa8   :  { %v313_v50 = vadd.f32 %v300_v26, %v166_v53  ;;  %v447_v29 = vmul.f32 %v425_v4, %v2372_v59  ;;  %v3035_v20 = vpack.c.bf16 %v3033_v7, %v3034_v19  ;;  %v3038_v25 = vpack.c.bf16 %v3036_v62, %v3037_v21  ;;  %v694_v27 = vld [vmem:[%s2918_s3 + $0x368] sm:$0xff]  ;;  %v680_v26 = vld [vmem:[%s2918_s3 + $0x2f8] sm:$0xff]  ;;  %v711_v4 = vld [vmem:[%s2918_s3 + $0x3f0] sm:$0xff] }
  0xa9   :  { %v1649_v31 = vpack.c.bf16 %v692_v40, %v691_v39  ;;  %v315_v10 = vadd.f32 %v302_v61, %v168_v15  ;;  %v449_v2 = vmul.f32 %v433_v35, %v2372_v59  ;;  %v3041_v28 = vpack.c.bf16 %v3039_v56, %v3040_v32  ;;  %v679_v59 = vld [vmem:[%s2918_s3 + $0x2f0] sm:$0xff]  ;;  %v712_v35 = vld [vmem:[%s2918_s3 + $0x3f8] sm:$0xff]  ;;  %v3045_v51 = vld [vmem:[#allocation2_spill] sm:$0xff] }
  0xaa   :  { %1614 = vmatpush3.bf16.msra.mxu0 %v3035_v20  ;;  %1646 = vmatpush3.bf16.msra.mxu1 %v3038_v25  ;;  %v3044_v43 = vpack.c.bf16 %v3042_v34, %v3043_v22  ;;  %v1619_v41 = vpack.c.bf16 %v678_v5, %v677_v33  ;;  %v1651_v17 = vpack.c.bf16 %v710_v55, %v709_v23  ;;  %v663_v61 = vld [vmem:[%s2918_s3 + $0x270] sm:$0xff]  ;;  %v3046_v8 = vsub.s32 3, %v3045_v51  ;;  %v729_v52 = vld [vmem:[%s2918_s3 + $0x480] sm:$0xff]  ;;  %v762_v57 = vld [vmem:[%s2918_s3 + $0x588] sm:$0xff] }
  0xab   :  { %1616 = vmatprep.subr.bf16.mxu0 %v3041_v28  ;;  %v455_v36 = vadd.f32 %v442_v48, %v308_v24  ;;  %v487_v42 = vrot.slane %v2038_v63, %v2017_v54  ;;  %v457_v9 = vadd.f32 %v444_v12, %v310_v6  ;;  %v495_v14 = vrot.slane %v2038_v63, %v3010_v49  ;;  %v664_v54 = vld [vmem:[%s2918_s3 + $0x278] sm:$0xff]  ;;  %v761_v33 = vld [vmem:[%s2918_s3 + $0x580] sm:$0xff]  ;;  %v714_v12 = vld [vmem:[%s2918_s3 + $0x408] sm:$0xff] }
  0xac   :  { %1648 = vmatprep.subr.bf16.mxu1 %v3044_v43  ;;  %v1621_v44 = vpack.c.bf16 %v662_v0, %v661_v60  ;;  %v460_v1 = vadd.f32 %v447_v29, %v313_v50  ;;  %v507_v46 = vrot.slane %v2477_v38, %v1996_v45  ;;  %v1653_v47 = vpack.c.bf16 %v694_v27, %v693_v18  ;;  %v713_v23 = vld [vmem:[%s2918_s3 + $0x400] sm:$0xff]  ;;  %v731_v7 = vld [vmem:[%s2918_s3 + $0x490] sm:$0xff]  ;;  %v732_v19 = vld [vmem:[%s2918_s3 + $0x498] sm:$0xff] }
  0xad   :  { %v462_v3 = vadd.f32 %v449_v2, %v315_v10  ;;  %v515_v63 = vrot.slane %v2477_v38, %v3046_v8  ;;  %v1623_v49 = vpack.c.bf16 %v680_v26, %v679_v59  ;;  %v1655_v45 = vpack.c.bf16 %v712_v35, %v711_v4  ;;  %v730_v38 = vld [vmem:[%s2918_s3 + $0x488] sm:$0xff]  ;;  %v745_v15 = vld [vmem:[%s2918_s3 + $0x500] sm:$0xff]  ;;  %v763_v62 = vld [vmem:[%s2918_s3 + $0x590] sm:$0xff] }
  0xae   :  { %1618 = vmatpush3.bf16.msra.mxu0 %v1617_v37  ;;  %1650 = vmatpush3.bf16.msra.mxu1 %v1649_v31  ;;  %v537_v39 = vadd.f32 %v487_v42, %v455_v36  ;;  %v539_v40 = vadd.f32 %v495_v14, %v457_v9  ;;  %v542_v48 = vadd.f32 %v507_v46, %v460_v1  ;;  %v746_v37 = vld [vmem:[%s2918_s3 + $0x508] sm:$0xff]  ;;  %v764_v21 = vld [vmem:[%s2918_s3 + $0x598] sm:$0xff]  ;;  %v715_v0 = vld [vmem:[%s2918_s3 + $0x410] sm:$0xff]  ;;  %vm558_vm13 = vcmp.gt.f32.partialorder %v2610_v16, 0.0 }
  0xaf   :  { %1620 = vmatprep.subr.bf16.mxu0 %v1619_v41  ;;  %1652 = vmatprep.subr.bf16.mxu1 %v1651_v17  ;;  %v1625_v53 = vpack.c.bf16 %v664_v54, %v663_v61  ;;  %v1657_v5 = vpack.c.bf16 %v696_v13, %v695_v58  ;;  %v544_v55 = vadd.f32 %v515_v63, %v462_v3  ;;  %v716_v10 = vld [vmem:[%s2918_s3 + $0x418] sm:$0xff]  ;;  %v747_v2 = vld [vmem:[%s2918_s3 + $0x510] sm:$0xff]  ;;  %v733_v43 = vld [vmem:[%s2918_s3 + $0x4a0] sm:$0xff] }
  0xb0   :  { %v1659_v24 = vpack.c.bf16 %v730_v38, %v729_v52  ;;  %v1691_v6 = vpack.c.bf16 %v762_v57, %v761_v33  ;;  %v563_v50 = vmul.f32 0.01, %v537_v39  ;;  %v565_v29 = vmul.f32 0.01, %v539_v40  ;;  %v748_v22 = vld [vmem:[%s2918_s3 + $0x518] sm:$0xff]  ;;  %v734_v41 = vld [vmem:[%s2918_s3 + $0x4a8] sm:$0xff] }
  0xb1   :  { %vm550_vm6 = vcmp.gt.f32.partialorder %v537_v39, 0.0  ;;  %vm552_vm7 = vcmp.gt.f32.partialorder %v539_v40, 0.0  ;;  %v568_v20 = vmul.f32 0.01, %v542_v48  ;;  %v1661_v25 = vpack.c.bf16 %v714_v12, %v713_v23  ;;  %v765_v18 = vld [vmem:[%s2918_s3 + $0x5a0] sm:$0xff]  ;;  %v766_v27 = vld [vmem:[%s2918_s3 + $0x5a8] sm:$0xff] }
  0xb2   :  { %1622 = vmatpush3.bf16.msra.mxu0 %v1621_v44  ;;  %1654 = vmatpush3.bf16.msra.mxu1 %v1653_v47  ;;  %vm555_vm8 = vcmp.gt.f32.partialorder %v542_v48, 0.0  ;;  %v570_v31 = vmul.f32 0.01, %v544_v55  ;;  %v1693_v60 = vpack.c.bf16 %v746_v37, %v745_v15  ;;  %vm557_vm9 = vcmp.gt.f32.partialorder %v544_v55, 0.0  ;;  %v717_v36 = vld [vmem:[%s2918_s3 + $0x420] sm:$0xff]  ;;  %v718_v42 = vld [vmem:[%s2918_s3 + $0x428] sm:$0xff] }
  0xb3   :  { %1624 = vmatprep.subr.bf16.mxu0 %v1623_v49  ;;  %1656 = vmatprep.subr.bf16.mxu1 %v1655_v45  ;;  %v576_v56 = vsel %vm550_vm6, %v537_v39, %v563_v50  ;;  %v578_v32 = vsel %vm552_vm7, %v539_v40, %v565_v29  ;;  %v1663_v28 = vpack.c.bf16 %v732_v19, %v731_v7  ;;  %v749_v9 = vld [vmem:[%s2918_s3 + $0x520] sm:$0xff]  ;;  %v750_v44 = vld [vmem:[%s2918_s3 + $0x528] sm:$0xff]  ;;  %v735_v1 = vld [vmem:[%s2918_s3 + $0x4b0] sm:$0xff] }
  0xb4   :  { %v1695_v34 = vpack.c.bf16 %v764_v21, %v763_v62  ;;  %v581_v17 = vsel %vm555_vm8, %v542_v48, %v568_v20  ;;  %v583_v59 = vsel %vm557_vm9, %v544_v55, %v570_v31  ;;  %v1665_v26 = vpack.c.bf16 %v716_v10, %v715_v0  ;;  %v736_v46 = vld [vmem:[%s2918_s3 + $0x4b8] sm:$0xff]  ;;  %v767_v47 = vld [vmem:[%s2918_s3 + $0x5b0] sm:$0xff]  ;;  %v737_v13 = vld [vmem:[%s2918_s3 + $0x4c0] sm:$0xff] }
  0xb5   :  { %v1697_v4 = vpack.c.bf16 %v748_v22, %v747_v2  ;;  %v1667_v35 = vpack.c.bf16 %v734_v41, %v733_v43  ;;  %v1699_v14 = vpack.c.bf16 %v766_v27, %v765_v18  ;;  %v768_v61 = vld [vmem:[%s2918_s3 + $0x5b8] sm:$0xff]  ;;  %v1669_v54 = vpack.c.bf16 %v718_v42, %v717_v36  ;;  %v719_v8 = vld [vmem:[%s2918_s3 + $0x430] sm:$0xff]  ;;  %v738_v52 = vld [vmem:[%s2918_s3 + $0x4c8] sm:$0xff] }
  0xb6   :  { %1626 = vmatpush3.bf16.msra.mxu0 %v1625_v53  ;;  %1658 = vmatpush3.bf16.msra.mxu1 %v1657_v5  ;;  %v1701_v3 = vpack.c.bf16 %v750_v44, %v749_v9  ;;  %v1671_v51 = vpack.c.bf16 %v736_v46, %v735_v1  ;;  %v720_v63 = vld [vmem:[%s2918_s3 + $0x438] sm:$0xff]  ;;  %v751_v49 = vld [vmem:[%s2918_s3 + $0x530] sm:$0xff]  ;;  %v1703_v45 = vpack.c.bf16 %v768_v61, %v767_v47  ;;  %v769_v39 = vld [vmem:[%s2918_s3 + $0x5c0] sm:$0xff]  ;;  %v567_v61 = vmul.f32 0.01, %v2541_v30 }
  0xb7   :  { %1660 = vmatprep.subr.bf16.mxu0 %v1659_v24  ;;  %1692 = vmatprep.subr.bf16.mxu1 %v1691_v6  ;;  %v752_v58 = vld [vmem:[%s2918_s3 + $0x538] sm:$0xff]  ;;  %v770_v40 = vld [vmem:[%s2918_s3 + $0x5c8] sm:$0xff]  ;;  %v1673_v38 = vpack.c.bf16 %v720_v63, %v719_v8  ;;  %v1675_v57 = vpack.c.bf16 %v738_v52, %v737_v13  ;;  %v721_v48 = vld [vmem:[%s2918_s3 + $0x440] sm:$0xff] }
  0xb8   :  { %v1705_v33 = vpack.c.bf16 %v752_v58, %v751_v49  ;;  %v722_v53 = vld [vmem:[%s2918_s3 + $0x448] sm:$0xff]  ;;  %v753_v5 = vld [vmem:[%s2918_s3 + $0x540] sm:$0xff]  ;;  %v1707_v23 = vpack.c.bf16 %v770_v40, %v769_v39  ;;  %v739_v24 = vld [vmem:[%s2918_s3 + $0x4d0] sm:$0xff]  ;;  %v580_v49 = vsel %vm554_vm10, %v2541_v30, %v567_v61  ;;  %v1750_v39 = vmov 0.0  }
  0xb9   :  { %1001 = vmatmul.mubr.f32.vlgmr.msra.gmra.mrb[2].mxu0 %v576_v56  ;;  %1071 = vmatmul.mubr.f32.vlgmr.msra.gmra.mrb[2].mxu1 %v578_v32  ;;  %v754_v55 = vld [vmem:[%s2918_s3 + $0x548] sm:$0xff]  ;;  %v740_v6 = vld [vmem:[%s2918_s3 + $0x4d8] sm:$0xff]  ;;  %v771_v12 = vld [vmem:[%s2918_s3 + $0x5d0] sm:$0xff]  ;;  %v1677_v37 = vpack.c.bf16 %v722_v53, %v721_v48 }
  0xba   :  { %1662 = vmatpush3.bf16.msra.mxu0 %v1661_v25  ;;  %1140 = vmatprep.mubr.f32.mxu0 %v581_v17  ;;  %v772_v15 = vld [vmem:[%s2918_s3 + $0x5d8] sm:$0xff]  ;;  %v1709_v50 = vpack.c.bf16 %v754_v55, %v753_v5  ;;  %v1679_v29 = vpack.c.bf16 %v740_v6, %v739_v24  ;;  %v723_v7 = vld [vmem:[%s2918_s3 + $0x450] sm:$0xff]  ;;  %v741_v25 = vld [vmem:[%s2918_s3 + $0x4e0] sm:$0xff] }
  0xbb   :  { %1694 = vmatpush3.bf16.msra.mxu1 %v1693_v60  ;;  %1210 = vmatprep.mubr.f32.mxu1 %v583_v59  ;;  %v724_v19 = vld [vmem:[%s2918_s3 + $0x458] sm:$0xff]  ;;  %v755_v20 = vld [vmem:[%s2918_s3 + $0x550] sm:$0xff]  ;;  %v1711_v62 = vpack.c.bf16 %v772_v15, %v771_v12  ;;  %v742_v31 = vld [vmem:[%s2918_s3 + $0x4e8] sm:$0xff] }
  0xbc   :  { %1664 = vmatprep.subr.bf16.mxu0 %v1663_v28  ;;  %1696 = vmatprep.subr.bf16.mxu1 %v1695_v34  ;;  %v756_v21 = vld [vmem:[%s2918_s3 + $0x558] sm:$0xff]  ;;  %v773_v60 = vld [vmem:[%s2918_s3 + $0x5e0] sm:$0xff]  ;;  %v774_v0 = vld [vmem:[%s2918_s3 + $0x5e8] sm:$0xff]  ;;  %v1681_v10 = vpack.c.bf16 %v724_v19, %v723_v7  ;;  %v1683_v56 = vpack.c.bf16 %v742_v31, %v741_v25 }
  0xbd   :  { %v1713_v2 = vpack.c.bf16 %v756_v21, %v755_v20  ;;  %v725_v32 = vld [vmem:[%s2918_s3 + $0x460] sm:$0xff]  ;;  %v726_v28 = vld [vmem:[%s2918_s3 + $0x468] sm:$0xff]  ;;  %v1715_v22 = vpack.c.bf16 %v774_v0, %v773_v60  ;;  %v743_v41 = vld [vmem:[%s2918_s3 + $0x4f0] sm:$0xff] }
  0xbe   :  { %1666 = vmatpush3.bf16.msra.mxu0 %v1665_v26  ;;  %v757_v34 = vld [vmem:[%s2918_s3 + $0x560] sm:$0xff]  ;;  %v758_v43 = vld [vmem:[%s2918_s3 + $0x568] sm:$0xff]  ;;  %v744_v17 = vld [vmem:[%s2918_s3 + $0x4f8] sm:$0xff]  ;;  %v1685_v59 = vpack.c.bf16 %v726_v28, %v725_v32 }
  0xbf   :  { %1698 = vmatpush3.bf16.msra.mxu1 %v1697_v4  ;;  %1668 = vmatprep.subr.bf16.mxu0 %v1667_v35  ;;  %v775_v18 = vld [vmem:[%s2918_s3 + $0x5f0] sm:$0xff]  ;;  %v776_v27 = vld [vmem:[%s2918_s3 + $0x5f8] sm:$0xff]  ;;  %v1717_v26 = vpack.c.bf16 %v758_v43, %v757_v34  ;;  %v1687_v4 = vpack.c.bf16 %v744_v17, %v743_v41  ;;  %v777_v46 = vld [vmem:[%s2918_s3 + $0x600] sm:$0xff] }
  0xc0   :  { %1700 = vmatprep.subr.bf16.mxu1 %v1699_v14  ;;  %v727_v35 = vld [vmem:[%s2918_s3 + $0x470] sm:$0xff]  ;;  %v728_v36 = vld [vmem:[%s2918_s3 + $0x478] sm:$0xff]  ;;  %v1719_v42 = vpack.c.bf16 %v776_v27, %v775_v18  ;;  %v778_v47 = vld [vmem:[%s2918_s3 + $0x608] sm:$0xff] }
  0xc1   :  { %v759_v9 = vld [vmem:[%s2918_s3 + $0x570] sm:$0xff]  ;;  %v760_v14 = vld [vmem:[%s2918_s3 + $0x578] sm:$0xff]  ;;  %v1689_v44 = vpack.c.bf16 %v728_v36, %v727_v35  ;;  %v781_v13 = vld [vmem:[%s2918_s3 + $0x620] sm:$0xff] }
  0xc2   :  { %1670 = vmatpush3.bf16.msra.mxu0 %v1669_v54  ;;  %v1721_v1 = vpack.c.bf16 %v760_v14, %v759_v9  ;;  %v569_v54 = vmul.f32 0.01, %v2561_v11  ;;  %v779_v8 = vld [vmem:[%s2918_s3 + $0x610] sm:$0xff]  ;;  %v780_v63 = vld [vmem:[%s2918_s3 + $0x618] sm:$0xff]  ;;  %v782_v52 = vld [vmem:[%s2918_s3 + $0x628] sm:$0xff] }
  0xc3   :  { %1702 = vmatpush3.bf16.msra.mxu1 %v1701_v3  ;;  %1672 = vmatprep.subr.bf16.mxu0 %v1671_v51  ;;  %v1724_v3 = vpack.c.bf16 %v778_v47, %v777_v46  ;;  %v1748_v51 = vmov 0.0|0.0   ;;  %v1727_v58 = vpack.c.bf16 %v780_v63, %v779_v8  ;;  %v1730_v30 = vpack.c.bf16 %v782_v52, %v781_v13  ;;  %v784_v40 = vld [vmem:[%s2918_s3 + $0x638] sm:$0xff]  ;;  %v1291_v5 = vld [vmem:[%s2921_s4] ss:$0 sm:$0xff] }
  0xc4   :  { %1704 = vmatprep.subr.bf16.mxu1 %v1703_v45  ;;  %v582_v45 = vsel %vm556_vm11, %v2561_v11, %v569_v54  ;;  %v783_v11 = vld [vmem:[%s2918_s3 + $0x630] sm:$0xff] }
  0xc6   :  { %1674 = vmatpush3.bf16.msra.mxu0 %v1673_v38  ;;  %v1733_v38 = vpack.c.bf16 %v784_v40, %v783_v11 }
  0xc7   :  { %1706 = vmatpush3.bf16.msra.mxu1 %v1705_v33  ;;  %1676 = vmatprep.subr.bf16.mxu0 %v1675_v57  ;;  %v571_v33 = vmul.f32 0.01, %v2610_v16 }
  0xc8   :  { %1708 = vmatprep.subr.bf16.mxu1 %v1707_v23 }
  0xc9   :  { %v584_v57 = vsel %vm558_vm13, %v2610_v16, %v571_v33 }
  0xca   :  { %1678 = vmatpush3.bf16.msra.mxu0 %v1677_v37 }
  0xcb   :  { %1710 = vmatpush3.bf16.msra.mxu1 %v1709_v50  ;;  %1680 = vmatprep.subr.bf16.mxu0 %v1679_v29 }
  0xcc   :  { %1712 = vmatprep.subr.bf16.mxu1 %v1711_v62 }
  0xce   :  { %1682 = vmatpush3.bf16.msra.mxu0 %v1681_v10 }
  0xcf   :  { %1714 = vmatpush3.bf16.msra.mxu1 %v1713_v2  ;;  %1684 = vmatprep.subr.bf16.mxu0 %v1683_v56 }
  0xd0   :  { %1716 = vmatprep.subr.bf16.mxu1 %v1715_v22 }
  0xd2   :  { %1686 = vmatpush3.bf16.msra.mxu0 %v1685_v59 }
  0xd3   :  { %1718 = vmatpush3.bf16.msra.mxu1 %v1717_v26  ;;  %1688 = vmatprep.subr.bf16.mxu0 %v1687_v4 }
  0xd4   :  { %1720 = vmatprep.subr.bf16.mxu1 %v1719_v42 }
  0xd6   :  { %1690 = vmatpush3.bf16.msra.mxu0 %v1689_v44 }
  0xd7   :  { %1722 = vmatpush3.bf16.msra.mxu1 %v1721_v1  ;;  %1723 = vmatprep.subr.bf16.mxu0 %v1748_v51 }
  0xd9   :  { %1141 = vmatmul.mubr.f32.vlgmr.msra.gmra.mrb[4].mxu0 %v580_v49 }
  0xda   :  { %1211 = vmatmul.mubr.f32.vlgmr.msra.gmra.mrb[4].mxu1 %v582_v45  ;;  %1725 = vmatpush3.bf16.msra.mxu0 %v1724_v3 }
  0xdb   :  { %1726 = vmatprep.subr.bf16.mxu0 %v1748_v51  ;;  %1528 = vmatprep.mubr.msk.f32.mxu0 %vm1749_vm12, %v1750_v39 }
  0xde   :  { %1728 = vmatpush3.bf16.msra.mxu0 %v1727_v58 }
  0xdf   :  { %1729 = vmatprep.subr.bf16.mxu0 %v1748_v51 }
  0xe2   :  { %1731 = vmatpush3.bf16.msra.mxu0 %v1730_v30 }
  0xe3   :  { %1732 = vmatprep.subr.bf16.mxu0 %v1748_v51 }
  0xe6   :  { %1734 = vmatpush3.bf16.msra.mxu0 %v1733_v38 }
  0xe9   :  { %1529 = vmatmul.mubr.msk.f32.vlgmr.msra.gmra.mrb[6].mxu0 %vm792_vm14, %v584_v57 }
 0x167   :  { %v1325_v48 = vpop.f32.mrb[0].mxu0  ;;  %v1360_v53 = vpop.f32.mrb[0].mxu1 }
 0x168   :  { %v1326_v23 = vpop.f32.mrb[1].mxu0  ;;  %v1361_v55 = vpop.f32.mrb[1].mxu1 }
 0x169   :  { %v1327_v24 = vadd.f32 %v1326_v23, %v1325_v48  ;;  %v1362_v6 = vadd.f32 %v1361_v55, %v1360_v53 }
 0x16b   :  { %v863_v12 = vadd.f32 %v1327_v24, %v1291_v5 }
 0x16d   :  { %v933_v15 = vadd.f32 %v1362_v6, %v863_v12 }
 0x18c   :  { %v1395_v37 = vpop.f32.mrb[2].mxu0  ;;  %v1430_v50 = vpop.f32.mrb[2].mxu1 }
 0x18d   :  { %v1396_v29 = vpop.f32.mrb[3].mxu0  ;;  %v1431_v7 = vpop.f32.mrb[3].mxu1 }
 0x18e   :  { %v1397_v19 = vadd.f32 %v1396_v29, %v1395_v37  ;;  %v1432_v20 = vadd.f32 %v1431_v7, %v1430_v50 }
 0x190   :  { %v1003_v16 = vadd.f32 %v1397_v19, %v933_v15 }
 0x192   :  { %v1073_v62 = vadd.f32 %v1432_v20, %v1003_v16 }
 0x1ac   :  { %v1465_v21 = vpop.f32.mrb[4].mxu0 }
 0x1ad   :  { %v1500_v25 = vpop.f32.mrb[4].mxu1  ;;  %v1466_v31 = vpop.f32.mrb[5].mxu0 }
 0x1ae   :  { %v1467_v60 = vadd.f32 %v1466_v31, %v1465_v21  ;;  %v1501_v0 = vpop.f32.mrb[5].mxu1 }
 0x1af   :  { %v1502_v10 = vadd.f32 %v1501_v0, %v1500_v25 }
 0x1b0   :  { %v1143_v2 = vadd.f32 %v1467_v60, %v1073_v62 }
 0x1b2   :  { %v1213_v56 = vadd.f32 %v1502_v10, %v1143_v2 }
 0x1bc   :  { %v1282_v32 = vpop.f32.mrb[6].mxu0 }
 0x1bd   :  { %v1283_v28 = vadd.f32 %v1282_v32, %v1213_v56  ;;  %v1530_v34 = vpop.f32.mrb[7].mxu0 }
 0x1bf   :  { %1286 = vst [vmem:[%s2922_s5] sm:$0xff] %v1283_v28 }

</bundles_post_ra>
